<compile_context>
chip_gen: v6e
topology: v6e:2x2x1
jax: 0.10.0
libtpu: 0.0.40
codegen_flags: <defaults>
</compile_context>

<pallas_src>
import math
from functools import partial

import jax
import jax.numpy as jnp
from jax.experimental import pallas as pl
from jax.experimental.pallas import tpu as pltpu


def mha_kernel(x_ref, wqkv_ref, bqkv_ref, wo_ref, bo_ref, o_ref,
               *, num_heads, d_k):
    bb, S, D = x_ref.shape
    rows = bb * S

    # Fused QKV projection: one lane-dense (rows, 3D) MXU matmul with f32
    # accumulation, one fused bias broadcast, one cast to bf16 for all
    # downstream MXU consumers.  1/sqrt(d_k) is already folded into the Q
    # columns of wqkv/bqkv.
    x2d = x_ref[...].reshape(rows, D).astype(jnp.bfloat16)
    qkv = jnp.dot(x2d, wqkv_ref[...], preferred_element_type=jnp.float32)
    qkv = (qkv + bqkv_ref[...]).astype(jnp.bfloat16).reshape(bb, S, 3 * D)

    # Per-head scaled-dot-product attention.  The head loop is statically
    # unrolled; each head's context feeds its d_k-row slice of Wo immediately,
    # so the only stores/accumulates are lane-dense (rows, D) -- no masked
    # sub-128-lane writes, no concatenate, no scratch slab.
    out = jnp.zeros((rows, D), jnp.float32)
    for h in range(num_heads):
        q0 = h * d_k
        qh = qkv[:, :, q0:q0 + d_k]
        kh = qkv[:, :, D + q0:D + q0 + d_k]
        vh = qkv[:, :, 2 * D + q0:2 * D + q0 + d_k]

        # scores: contract last dims directly (no explicit kh.T transpose)
        s = jnp.einsum("bqd,bkd->bqk", qh, kh,
                       preferred_element_type=jnp.float32)

        # numerically-stable softmax in f32; divide -> EUP reciprocal
        s = s - jnp.max(s, axis=-1, keepdims=True)
        e = jnp.exp(s)
        denom = jnp.sum(e, axis=-1, keepdims=True)
        p = (e * pl.reciprocal(denom, approx=True)).astype(jnp.bfloat16)
        # TODO(synk): nn.Dropout(attn_drop) on the attention weights is an
        # eval-mode identity; training-time dropout is not implemented.

        ctx_h = jnp.einsum("bqk,bkd->bqd", p, vh,
                           preferred_element_type=jnp.float32)
        ctx_h = ctx_h.reshape(rows, d_k).astype(jnp.bfloat16)

        # Output projection for this head: (rows, d_k) @ (d_k, D) accumulated
        # into the lane-dense f32 output (out = sum_h ctx_h @ Wo[h*dk:(h+1)*dk]).
        out = out + jnp.dot(ctx_h, wo_ref[q0:q0 + d_k, :],
                            preferred_element_type=jnp.float32)

    out = out + bo_ref[...]
    o_ref[...] = out.reshape(bb, S, D).astype(o_ref.dtype)


def _tpu_caps():
    """Best-effort (VMEM capacity, TensorCore count); safe fallbacks."""
    vmem_cap = 64 * 2 ** 20   # v7x-safe default
    num_cores = 1             # conservative: don't split the grid for nothing
    try:
        info = pltpu.get_tpu_info()
        for name in ("vmem_capacity_bytes", "vmem_bytes", "vmem_size_bytes"):
            v = getattr(info, name, None)
            if v:
                vmem_cap = int(v)
                break
        for name in ("num_cores", "core_count", "num_tensorcores",
                     "tensorcores_per_chip"):
            v = getattr(info, name, None)
            if v:
                num_cores = int(v)
                break
    except Exception:
        pass
    return vmem_cap, num_cores


def multi_head_attention(x, params, num_heads):
    B, S, D = x.shape
    assert D % num_heads == 0
    d_k = D // num_heads
    scale = 1.0 / math.sqrt(d_k)

    # Pack parameters once: bf16 weights for the MXU (f32 accumulation inside
    # the kernel), f32 biases fused to single (1, 3D) / (1, D) blocks.
    # 1/sqrt(d_k) is folded into the Q columns (x@(Wq*s)+bq*s == Q*s).
    wqkv = jnp.concatenate([params["wq"] * scale, params["wk"], params["wv"]],
                           axis=1).astype(jnp.bfloat16)          # (D, 3D)
    bqkv = jnp.concatenate([params["bq"] * scale, params["bk"], params["bv"]],
                           axis=1).astype(jnp.float32)           # (1, 3D)
    wo = params["wo"].astype(jnp.bfloat16)                       # (D, D)
    bo = params["bo"].astype(jnp.float32)                        # (1, D)

    vmem_cap, num_cores = _tpu_caps()

    # Rows per grid step: target >= 256 projection rows (fills the 256-wide
    # v6e/v7x MXU; v5e just runs extra 128-deep passes).  Only cap bb to keep
    # >= 2 grid steps when there are actually multiple TensorCores to feed.
    bb = max(1, min(B, pl.cdiv(256, S)))
    if num_cores >= 2 and B >= 2:
        bb = min(bb, max(1, B // num_cores))
    while B % bb:
        bb -= 1
    rows = bb * S

    kernel = partial(mha_kernel, num_heads=num_heads, d_k=d_k)

    # VMEM budget: double-buffered resident weights + double-buffered x/out
    # blocks + major in-kernel intermediates (f32 qkv, bf16 qkv copy, output
    # accumulator, per-head SxS score/exp/prob buffers), with 2x headroom,
    # clamped to 80% of physical VMEM for this generation.
    itemsize = jnp.dtype(x.dtype).itemsize
    w_bytes = 2 * ((wqkv.size + wo.size) * 2 + (bqkv.size + bo.size) * 4)
    io_bytes = 2 * 2 * rows * D * itemsize
    inter_bytes = (rows * 3 * D * (4 + 2)      # f32 qkv + bf16 qkv
                   + rows * D * 4              # f32 output accumulator
                   + 3 * bb * S * S * 4)       # scores / exp / probs (per head)
    vmem_limit = int(min(0.8 * vmem_cap,
                         max(32 * 2 ** 20,
                             2 * (w_bytes + io_bytes + inter_bytes))))

    return pl.pallas_call(
        kernel,
        out_shape=jax.ShapeDtypeStruct((B, S, D), x.dtype),
        grid=(B // bb,),
        in_specs=[
            pl.BlockSpec((bb, S, D), lambda b: (b, 0, 0)),    # x block
            pl.BlockSpec((D, 3 * D), lambda b: (0, 0)),       # fused Wqkv
            pl.BlockSpec((1, 3 * D), lambda b: (0, 0)),       # fused qkv bias
            pl.BlockSpec((D, D), lambda b: (0, 0)),           # Wo
            pl.BlockSpec((1, D), lambda b: (0, 0)),           # bo
        ],
        out_specs=pl.BlockSpec((bb, S, D), lambda b: (b, 0, 0)),
        compiler_params=pltpu.CompilerParams(
            dimension_semantics=("parallel",),
            vmem_limit_bytes=vmem_limit),
    )(x, wqkv, bqkv, wo, bo)


def reference_mha(x, params, num_heads):
    """Pure-JAX f32 reference replicating the PyTorch forward (eval mode)."""
    B, S, D = x.shape
    d_k = D // num_heads
    q = x @ params["wq"] + params["bq"]
    k = x @ params["wk"] + params["bk"]
    v = x @ params["wv"] + params["bv"]
    q = q.reshape(B, S, num_heads, d_k).transpose(0, 2, 1, 3)
    k = k.reshape(B, S, num_heads, d_k).transpose(0, 2, 1, 3)
    v = v.reshape(B, S, num_heads, d_k).transpose(0, 2, 1, 3)
    dot = jnp.einsum("bhqd,bhkd->bhqk", q, k) / math.sqrt(d_k)
    attn = jax.nn.softmax(dot, axis=-1)
    out = jnp.einsum("bhqk,bhkd->bhqd", attn, v)
    out = out.transpose(0, 2, 1, 3).reshape(B, S, D)
    return out @ params["wo"] + params["bo"]


def init_params(key, dim):
    """Deterministic synthetic parameters (PyTorch-Linear-like uniform init)."""
    ks = jax.random.split(key, 8)
    bound = 1.0 / math.sqrt(dim)

    def w(k):
        return jax.random.uniform(k, (dim, dim), jnp.float32, -bound, bound)

    def b(k):
        return jax.random.uniform(k, (1, dim), jnp.float32, -bound, bound)

    return {
        "wq": w(ks[0]), "bq": b(ks[1]),
        "wk": w(ks[2]), "bk": b(ks[3]),
        "wv": w(ks[4]), "bv": b(ks[5]),
        "wo": w(ks[6]), "bo": b(ks[7]),
    }


if __name__ == "__main__":
    # Small shapes consistent with the module (dim divisible by num_heads).
    B, S, D, H = 2, 8, 32, 4

    key = jax.random.PRNGKey(0)
    kx, kp, kx2 = jax.random.split(key, 3)
    x = jax.random.normal(kx, (B, S, D), jnp.float32)
    params = init_params(kp, D)

    out = jax.block_until_ready(multi_head_attention(x, params, num_heads=H))
    ref = reference_mha(x, params, num_heads=H)
    assert out.shape == (B, S, D)
    # bf16 matmul inputs (f32 accumulation) -> bf16-class tolerance vs f32 ref.
    assert jnp.allclose(out, ref, atol=3e-2, rtol=3e-2), "mismatch vs reference"

    # Second config exercises multiple batch rows per grid step (bb > 1).
    B2 = 4
    x2 = jax.random.normal(kx2, (B2, S, D), jnp.float32)
    out2 = jax.block_until_ready(multi_head_attention(x2, params, num_heads=H))
    ref2 = reference_mha(x2, params, num_heads=H)
    assert out2.shape == (B2, S, D)
    assert jnp.allclose(out2, ref2, atol=3e-2, rtol=3e-2), "mismatch (bb>1)"

    print("KERNEL_OK")
</pallas_src>

<mosaic_0001>
module attributes {stable_mosaic.version = 11 : i64} {
  func.func @mha_kernel(%arg0: i32, %arg1: memref<2x8x32xf32, #tpu.memory_space<vmem>>, %arg2: memref<32x96xbf16, #tpu.memory_space<vmem>>, %arg3: memref<1x96xf32, #tpu.memory_space<vmem>>, %arg4: memref<32x32xbf16, #tpu.memory_space<vmem>>, %arg5: memref<1x32xf32, #tpu.memory_space<vmem>>, %arg6: memref<2x8x32xf32, #tpu.memory_space<vmem>>) attributes {dimension_semantics = [#tpu.dimension_semantics<parallel>], iteration_bounds = array<i64: 1>, scalar_prefetch = 0 : i64, scratch_operands = 0 : i64, tpu.core_type = #tpu.core_type<tc>, window_params = [{transform_indices = @transform_0, window_bounds = array<i64: 2, 8, 32>}, {pipeline_mode = #tpu.pipeline_mode<synchronous>, transform_indices = @transform_1, window_bounds = array<i64: 32, 96>}, {pipeline_mode = #tpu.pipeline_mode<synchronous>, transform_indices = @transform_2, window_bounds = array<i64: 1, 96>}, {pipeline_mode = #tpu.pipeline_mode<synchronous>, transform_indices = @transform_3, window_bounds = array<i64: 32, 32>}, {pipeline_mode = #tpu.pipeline_mode<synchronous>, transform_indices = @transform_4, window_bounds = array<i64: 1, 32>}, {transform_indices = @transform_5, window_bounds = array<i64: 2, 8, 32>}]} {
    %c0 = arith.constant 0 : index
    %c0_0 = arith.constant 0 : index
    %c0_1 = arith.constant 0 : index
    %0 = vector.load %arg1[%c0, %c0_0, %c0_1] : memref<2x8x32xf32, #tpu.memory_space<vmem>>, vector<2x8x32xf32>
    %1 = vector.shape_cast %0 : vector<2x8x32xf32> to vector<16x32xf32>
    %2 = arith.truncf %1 : vector<16x32xf32> to vector<16x32xbf16>
    %c0_2 = arith.constant 0 : index
    %c0_3 = arith.constant 0 : index
    %3 = vector.load %arg2[%c0_2, %c0_3] : memref<32x96xbf16, #tpu.memory_space<vmem>>, vector<32x96xbf16>
    %cst = arith.constant dense<0.000000e+00> : vector<16x96xf32>
    %4 = tpu.matmul %2, %3, %cst {dimension_numbers = #tpu.dot_dimension_numbers<[1], [0], [0], [1], [0, 0, 1, 1], [], []>} : vector<16x32xbf16>, vector<32x96xbf16>, vector<16x96xf32> -> vector<16x96xf32>
    %c0_4 = arith.constant 0 : index
    %c0_5 = arith.constant 0 : index
    %5 = vector.load %arg3[%c0_4, %c0_5] : memref<1x96xf32, #tpu.memory_space<vmem>>, vector<1x96xf32>
    %6 = vector.broadcast %5 : vector<1x96xf32> to vector<16x96xf32>
    %7 = arith.addf %4, %6 : vector<16x96xf32>
    %8 = arith.truncf %7 : vector<16x96xf32> to vector<16x96xbf16>
    %9 = vector.shape_cast %8 : vector<16x96xbf16> to vector<2x8x96xbf16>
    %cst_6 = arith.constant 0.000000e+00 : f32
    %10 = vector.broadcast %cst_6 : f32 to vector<16x32xf32>
    %11 = vector.extract_strided_slice %9 {offsets = [0, 0, 0], sizes = [2, 8, 8], strides = [1, 1, 1]} : vector<2x8x96xbf16> to vector<2x8x8xbf16>
    %12 = vector.extract_strided_slice %9 {offsets = [0, 0, 32], sizes = [2, 8, 8], strides = [1, 1, 1]} : vector<2x8x96xbf16> to vector<2x8x8xbf16>
    %13 = vector.extract_strided_slice %9 {offsets = [0, 0, 64], sizes = [2, 8, 8], strides = [1, 1, 1]} : vector<2x8x96xbf16> to vector<2x8x8xbf16>
    "tpu.trace_start"() <{level = 10 : i32, message = "bqd,bkd->bqk"}> : () -> ()
    %cst_7 = arith.constant dense<0.000000e+00> : vector<2x8x8xf32>
    %14 = tpu.matmul %11, %12, %cst_7 {dimension_numbers = #tpu.dot_dimension_numbers<[2], [2], [1], [1], [0, 0, 0, 1, 1, 1], [0], [0]>} : vector<2x8x8xbf16>, vector<2x8x8xbf16>, vector<2x8x8xf32> -> vector<2x8x8xf32>
    "tpu.trace_stop"() : () -> ()
    %cst_8 = arith.constant dense<0xFF800000> : vector<2x8xf32>
    %15 = vector.multi_reduction <maximumf>, %14, %cst_8 [2] : vector<2x8x8xf32> to vector<2x8xf32>
    %16 = vector.shape_cast %15 : vector<2x8xf32> to vector<2x8x1xf32>
    %17 = vector.broadcast %16 : vector<2x8x1xf32> to vector<2x8x8xf32>
    %18 = arith.subf %14, %17 : vector<2x8x8xf32>
    %19 = math.exp %18 : vector<2x8x8xf32>
    %cst_9 = arith.constant dense<0.000000e+00> : vector<2x8xf32>
    %20 = vector.multi_reduction <add>, %19, %cst_9 [2] : vector<2x8x8xf32> to vector<2x8xf32>
    %21 = vector.shape_cast %20 : vector<2x8xf32> to vector<2x8x1xf32>
    %22 = tpu.reciprocal %21 {approx = true} : vector<2x8x1xf32> -> vector<2x8x1xf32>
    %23 = vector.broadcast %22 : vector<2x8x1xf32> to vector<2x8x8xf32>
    %24 = arith.mulf %19, %23 : vector<2x8x8xf32>
    %25 = arith.truncf %24 : vector<2x8x8xf32> to vector<2x8x8xbf16>
    "tpu.trace_start"() <{level = 10 : i32, message = "bqk,bkd->bqd"}> : () -> ()
    %cst_10 = arith.constant dense<0.000000e+00> : vector<2x8x8xf32>
    %26 = tpu.matmul %25, %13, %cst_10 {dimension_numbers = #tpu.dot_dimension_numbers<[2], [1], [1], [2], [0, 0, 0, 1, 1, 2], [0], [0]>} : vector<2x8x8xbf16>, vector<2x8x8xbf16>, vector<2x8x8xf32> -> vector<2x8x8xf32>
    "tpu.trace_stop"() : () -> ()
    %27 = vector.shape_cast %26 : vector<2x8x8xf32> to vector<16x8xf32>
    %28 = arith.truncf %27 : vector<16x8xf32> to vector<16x8xbf16>
    %c0_11 = arith.constant 0 : index
    %c0_12 = arith.constant 0 : index
    %29 = vector.load %arg4[%c0_11, %c0_12] : memref<32x32xbf16, #tpu.memory_space<vmem>>, vector<8x32xbf16>
    %cst_13 = arith.constant dense<0.000000e+00> : vector<16x32xf32>
    %30 = tpu.matmul %28, %29, %cst_13 {dimension_numbers = #tpu.dot_dimension_numbers<[1], [0], [0], [1], [0, 0, 1, 1], [], []>} : vector<16x8xbf16>, vector<8x32xbf16>, vector<16x32xf32> -> vector<16x32xf32>
    %31 = arith.addf %10, %30 : vector<16x32xf32>
    %32 = vector.extract_strided_slice %9 {offsets = [0, 0, 8], sizes = [2, 8, 8], strides = [1, 1, 1]} : vector<2x8x96xbf16> to vector<2x8x8xbf16>
    %33 = vector.extract_strided_slice %9 {offsets = [0, 0, 40], sizes = [2, 8, 8], strides = [1, 1, 1]} : vector<2x8x96xbf16> to vector<2x8x8xbf16>
    %34 = vector.extract_strided_slice %9 {offsets = [0, 0, 72], sizes = [2, 8, 8], strides = [1, 1, 1]} : vector<2x8x96xbf16> to vector<2x8x8xbf16>
    "tpu.trace_start"() <{level = 10 : i32, message = "bqd,bkd->bqk"}> : () -> ()
    %cst_14 = arith.constant dense<0.000000e+00> : vector<2x8x8xf32>
    %35 = tpu.matmul %32, %33, %cst_14 {dimension_numbers = #tpu.dot_dimension_numbers<[2], [2], [1], [1], [0, 0, 0, 1, 1, 1], [0], [0]>} : vector<2x8x8xbf16>, vector<2x8x8xbf16>, vector<2x8x8xf32> -> vector<2x8x8xf32>
    "tpu.trace_stop"() : () -> ()
    %cst_15 = arith.constant dense<0xFF800000> : vector<2x8xf32>
    %36 = vector.multi_reduction <maximumf>, %35, %cst_15 [2] : vector<2x8x8xf32> to vector<2x8xf32>
    %37 = vector.shape_cast %36 : vector<2x8xf32> to vector<2x8x1xf32>
    %38 = vector.broadcast %37 : vector<2x8x1xf32> to vector<2x8x8xf32>
    %39 = arith.subf %35, %38 : vector<2x8x8xf32>
    %40 = math.exp %39 : vector<2x8x8xf32>
    %cst_16 = arith.constant dense<0.000000e+00> : vector<2x8xf32>
    %41 = vector.multi_reduction <add>, %40, %cst_16 [2] : vector<2x8x8xf32> to vector<2x8xf32>
    %42 = vector.shape_cast %41 : vector<2x8xf32> to vector<2x8x1xf32>
    %43 = tpu.reciprocal %42 {approx = true} : vector<2x8x1xf32> -> vector<2x8x1xf32>
    %44 = vector.broadcast %43 : vector<2x8x1xf32> to vector<2x8x8xf32>
    %45 = arith.mulf %40, %44 : vector<2x8x8xf32>
    %46 = arith.truncf %45 : vector<2x8x8xf32> to vector<2x8x8xbf16>
    "tpu.trace_start"() <{level = 10 : i32, message = "bqk,bkd->bqd"}> : () -> ()
    %cst_17 = arith.constant dense<0.000000e+00> : vector<2x8x8xf32>
    %47 = tpu.matmul %46, %34, %cst_17 {dimension_numbers = #tpu.dot_dimension_numbers<[2], [1], [1], [2], [0, 0, 0, 1, 1, 2], [0], [0]>} : vector<2x8x8xbf16>, vector<2x8x8xbf16>, vector<2x8x8xf32> -> vector<2x8x8xf32>
    "tpu.trace_stop"() : () -> ()
    %48 = vector.shape_cast %47 : vector<2x8x8xf32> to vector<16x8xf32>
    %49 = arith.truncf %48 : vector<16x8xf32> to vector<16x8xbf16>
    %c8 = arith.constant 8 : index
    %c0_18 = arith.constant 0 : index
    %50 = vector.load %arg4[%c8, %c0_18] : memref<32x32xbf16, #tpu.memory_space<vmem>>, vector<8x32xbf16>
    %cst_19 = arith.constant dense<0.000000e+00> : vector<16x32xf32>
    %51 = tpu.matmul %49, %50, %cst_19 {dimension_numbers = #tpu.dot_dimension_numbers<[1], [0], [0], [1], [0, 0, 1, 1], [], []>} : vector<16x8xbf16>, vector<8x32xbf16>, vector<16x32xf32> -> vector<16x32xf32>
    %52 = arith.addf %31, %51 : vector<16x32xf32>
    %53 = vector.extract_strided_slice %9 {offsets = [0, 0, 16], sizes = [2, 8, 8], strides = [1, 1, 1]} : vector<2x8x96xbf16> to vector<2x8x8xbf16>
    %54 = vector.extract_strided_slice %9 {offsets = [0, 0, 48], sizes = [2, 8, 8], strides = [1, 1, 1]} : vector<2x8x96xbf16> to vector<2x8x8xbf16>
    %55 = vector.extract_strided_slice %9 {offsets = [0, 0, 80], sizes = [2, 8, 8], strides = [1, 1, 1]} : vector<2x8x96xbf16> to vector<2x8x8xbf16>
    "tpu.trace_start"() <{level = 10 : i32, message = "bqd,bkd->bqk"}> : () -> ()
    %cst_20 = arith.constant dense<0.000000e+00> : vector<2x8x8xf32>
    %56 = tpu.matmul %53, %54, %cst_20 {dimension_numbers = #tpu.dot_dimension_numbers<[2], [2], [1], [1], [0, 0, 0, 1, 1, 1], [0], [0]>} : vector<2x8x8xbf16>, vector<2x8x8xbf16>, vector<2x8x8xf32> -> vector<2x8x8xf32>
    "tpu.trace_stop"() : () -> ()
    %cst_21 = arith.constant dense<0xFF800000> : vector<2x8xf32>
    %57 = vector.multi_reduction <maximumf>, %56, %cst_21 [2] : vector<2x8x8xf32> to vector<2x8xf32>
    %58 = vector.shape_cast %57 : vector<2x8xf32> to vector<2x8x1xf32>
    %59 = vector.broadcast %58 : vector<2x8x1xf32> to vector<2x8x8xf32>
    %60 = arith.subf %56, %59 : vector<2x8x8xf32>
    %61 = math.exp %60 : vector<2x8x8xf32>
    %cst_22 = arith.constant dense<0.000000e+00> : vector<2x8xf32>
    %62 = vector.multi_reduction <add>, %61, %cst_22 [2] : vector<2x8x8xf32> to vector<2x8xf32>
    %63 = vector.shape_cast %62 : vector<2x8xf32> to vector<2x8x1xf32>
    %64 = tpu.reciprocal %63 {approx = true} : vector<2x8x1xf32> -> vector<2x8x1xf32>
    %65 = vector.broadcast %64 : vector<2x8x1xf32> to vector<2x8x8xf32>
    %66 = arith.mulf %61, %65 : vector<2x8x8xf32>
    %67 = arith.truncf %66 : vector<2x8x8xf32> to vector<2x8x8xbf16>
    "tpu.trace_start"() <{level = 10 : i32, message = "bqk,bkd->bqd"}> : () -> ()
    %cst_23 = arith.constant dense<0.000000e+00> : vector<2x8x8xf32>
    %68 = tpu.matmul %67, %55, %cst_23 {dimension_numbers = #tpu.dot_dimension_numbers<[2], [1], [1], [2], [0, 0, 0, 1, 1, 2], [0], [0]>} : vector<2x8x8xbf16>, vector<2x8x8xbf16>, vector<2x8x8xf32> -> vector<2x8x8xf32>
    "tpu.trace_stop"() : () -> ()
    %69 = vector.shape_cast %68 : vector<2x8x8xf32> to vector<16x8xf32>
    %70 = arith.truncf %69 : vector<16x8xf32> to vector<16x8xbf16>
    %c16 = arith.constant 16 : index
    %c0_24 = arith.constant 0 : index
    %71 = vector.load %arg4[%c16, %c0_24] : memref<32x32xbf16, #tpu.memory_space<vmem>>, vector<8x32xbf16>
    %cst_25 = arith.constant dense<0.000000e+00> : vector<16x32xf32>
    %72 = tpu.matmul %70, %71, %cst_25 {dimension_numbers = #tpu.dot_dimension_numbers<[1], [0], [0], [1], [0, 0, 1, 1], [], []>} : vector<16x8xbf16>, vector<8x32xbf16>, vector<16x32xf32> -> vector<16x32xf32>
    %73 = arith.addf %52, %72 : vector<16x32xf32>
    %74 = vector.extract_strided_slice %9 {offsets = [0, 0, 24], sizes = [2, 8, 8], strides = [1, 1, 1]} : vector<2x8x96xbf16> to vector<2x8x8xbf16>
    %75 = vector.extract_strided_slice %9 {offsets = [0, 0, 56], sizes = [2, 8, 8], strides = [1, 1, 1]} : vector<2x8x96xbf16> to vector<2x8x8xbf16>
    %76 = vector.extract_strided_slice %9 {offsets = [0, 0, 88], sizes = [2, 8, 8], strides = [1, 1, 1]} : vector<2x8x96xbf16> to vector<2x8x8xbf16>
    "tpu.trace_start"() <{level = 10 : i32, message = "bqd,bkd->bqk"}> : () -> ()
    %cst_26 = arith.constant dense<0.000000e+00> : vector<2x8x8xf32>
    %77 = tpu.matmul %74, %75, %cst_26 {dimension_numbers = #tpu.dot_dimension_numbers<[2], [2], [1], [1], [0, 0, 0, 1, 1, 1], [0], [0]>} : vector<2x8x8xbf16>, vector<2x8x8xbf16>, vector<2x8x8xf32> -> vector<2x8x8xf32>
    "tpu.trace_stop"() : () -> ()
    %cst_27 = arith.constant dense<0xFF800000> : vector<2x8xf32>
    %78 = vector.multi_reduction <maximumf>, %77, %cst_27 [2] : vector<2x8x8xf32> to vector<2x8xf32>
    %79 = vector.shape_cast %78 : vector<2x8xf32> to vector<2x8x1xf32>
    %80 = vector.broadcast %79 : vector<2x8x1xf32> to vector<2x8x8xf32>
    %81 = arith.subf %77, %80 : vector<2x8x8xf32>
    %82 = math.exp %81 : vector<2x8x8xf32>
    %cst_28 = arith.constant dense<0.000000e+00> : vector<2x8xf32>
    %83 = vector.multi_reduction <add>, %82, %cst_28 [2] : vector<2x8x8xf32> to vector<2x8xf32>
    %84 = vector.shape_cast %83 : vector<2x8xf32> to vector<2x8x1xf32>
    %85 = tpu.reciprocal %84 {approx = true} : vector<2x8x1xf32> -> vector<2x8x1xf32>
    %86 = vector.broadcast %85 : vector<2x8x1xf32> to vector<2x8x8xf32>
    %87 = arith.mulf %82, %86 : vector<2x8x8xf32>
    %88 = arith.truncf %87 : vector<2x8x8xf32> to vector<2x8x8xbf16>
    "tpu.trace_start"() <{level = 10 : i32, message = "bqk,bkd->bqd"}> : () -> ()
    %cst_29 = arith.constant dense<0.000000e+00> : vector<2x8x8xf32>
    %89 = tpu.matmul %88, %76, %cst_29 {dimension_numbers = #tpu.dot_dimension_numbers<[2], [1], [1], [2], [0, 0, 0, 1, 1, 2], [0], [0]>} : vector<2x8x8xbf16>, vector<2x8x8xbf16>, vector<2x8x8xf32> -> vector<2x8x8xf32>
    "tpu.trace_stop"() : () -> ()
    %90 = vector.shape_cast %89 : vector<2x8x8xf32> to vector<16x8xf32>
    %91 = arith.truncf %90 : vector<16x8xf32> to vector<16x8xbf16>
    %c24 = arith.constant 24 : index
    %c0_30 = arith.constant 0 : index
    %92 = vector.load %arg4[%c24, %c0_30] : memref<32x32xbf16, #tpu.memory_space<vmem>>, vector<8x32xbf16>
    %cst_31 = arith.constant dense<0.000000e+00> : vector<16x32xf32>
    %93 = tpu.matmul %91, %92, %cst_31 {dimension_numbers = #tpu.dot_dimension_numbers<[1], [0], [0], [1], [0, 0, 1, 1], [], []>} : vector<16x8xbf16>, vector<8x32xbf16>, vector<16x32xf32> -> vector<16x32xf32>
    %94 = arith.addf %73, %93 : vector<16x32xf32>
    %c0_32 = arith.constant 0 : index
    %c0_33 = arith.constant 0 : index
    %95 = vector.load %arg5[%c0_32, %c0_33] : memref<1x32xf32, #tpu.memory_space<vmem>>, vector<1x32xf32>
    %96 = vector.broadcast %95 : vector<1x32xf32> to vector<16x32xf32>
    %97 = arith.addf %94, %96 : vector<16x32xf32>
    %98 = vector.shape_cast %97 : vector<16x32xf32> to vector<2x8x32xf32>
    %c0_34 = arith.constant 0 : index
    %c0_35 = arith.constant 0 : index
    %c0_36 = arith.constant 0 : index
    %99 = vector.load %arg6[%c0_34, %c0_35, %c0_36] : memref<2x8x32xf32, #tpu.memory_space<vmem>>, vector<2x8x32xf32>
    tpu.vector_store %arg6[%c0_34, %c0_35, %c0_36], %98 {strides = array<i32>} : memref<2x8x32xf32, #tpu.memory_space<vmem>>, vector<2x8x32xf32>,
    return
  }
  func.func @transform_0(%arg0: i32) -> (i32, i32, i32) {
    %c0_i32 = arith.constant 0 : i32
    %c0_i32_0 = arith.constant 0 : i32
    %c0_i32_1 = arith.constant 0 : i32
    return %arg0, %c0_i32, %c0_i32_0 : i32, i32, i32
  }
  func.func @transform_1(%arg0: i32) -> (i32, i32) {
    %c0_i32 = arith.constant 0 : i32
    %c0_i32_0 = arith.constant 0 : i32
    %c0_i32_1 = arith.constant 0 : i32
    return %c0_i32, %c0_i32_0 : i32, i32
  }
  func.func @transform_2(%arg0: i32) -> (i32, i32) {
    %c0_i32 = arith.constant 0 : i32
    %c0_i32_0 = arith.constant 0 : i32
    %c0_i32_1 = arith.constant 0 : i32
    return %c0_i32, %c0_i32_0 : i32, i32
  }
  func.func @transform_3(%arg0: i32) -> (i32, i32) {
    %c0_i32 = arith.constant 0 : i32
    %c0_i32_0 = arith.constant 0 : i32
    %c0_i32_1 = arith.constant 0 : i32
    return %c0_i32, %c0_i32_0 : i32, i32
  }
  func.func @transform_4(%arg0: i32) -> (i32, i32) {
    %c0_i32 = arith.constant 0 : i32
    %c0_i32_0 = arith.constant 0 : i32
    %c0_i32_1 = arith.constant 0 : i32
    return %c0_i32, %c0_i32_0 : i32, i32
  }
  func.func @transform_5(%arg0: i32) -> (i32, i32, i32) {
    %c0_i32 = arith.constant 0 : i32
    %c0_i32_0 = arith.constant 0 : i32
    %c0_i32_1 = arith.constant 0 : i32
    return %arg0, %c0_i32, %c0_i32_0 : i32, i32, i32
  }
}

</mosaic_0001>

<bundles_post_ra>
// kernel: tpu_custom_call.1
= control target key start
LH: loop header
LB: loop body
LE: loop exit
PB: predicated region body
PF: predicated region fallthrough
CT: control target
= control target key end

     0   :  { %10 = vsyncpa [#allocation3], 0  ;;  %s1843_s0 = inlined_call_operand.hbm [shape: f32[2,8,32], index: 0, kind: input, shape index: {}]   ;;  %s1844_s1 = inlined_call_operand.hbm [shape: bf16[32,96], index: 1, kind: input, shape index: {}]   ;;  %s1845_s2 = inlined_call_operand.vmem [shape: f32[1,96], index: 2, kind: input, shape index: {}]   ;;  %s1846_s3 = inlined_call_operand.hbm [shape: bf16[32,32], index: 3, kind: input, shape index: {}]   ;;  %s1847_s4 = inlined_call_operand.vmem [shape: f32[1,32], index: 4, kind: input, shape index: {}]   ;;  %s1848_s5 = inlined_call_operand.hbm [shape: f32[2,8,32], index: 5, kind: output, shape index: {}]  }
   0x1   :  { %11 = vsyncpa [#allocation6], 0 }
   0x2   :  { %12 = vsyncpa [#allocation4], 0  ;;  %s1587_s18 = smov [#allocation5]  }
   0x3   :  { %s30_s19 = sshll.u32 %s1587_s18, 4  ;;  %s31_s19 = int_to_ptr.vmem [resolvable:$true] %s30_s19 }
   0x4   :  { %s1509_s20 = scalar_lea.vmem %s31_s19, 256  ;;  %p1514_p1 = scmp.lt.s32.totalorder %s31_s19, %s31_s19 }
   0x5   :  { %p1510_p0 = scmp.ne.s32.totalorder %s31_s19, %s1509_s20  ;;  %p1515_p2 = scmp.lt.s32.totalorder %s1509_s20, %s1509_s20 }
   0x7   :  { %p1516_p3 = por %p1515_p2, %p1514_p1 }
   0x9   :  { %p1517_p4 = pnand %p1516_p3, %p1510_p0 }
   0xb   :  { %1520 = shalt.err (!%p1517_p4)
}
   0xc   :  { %s1588_s21 = smov 64   ;;  %s1589_s22 = smov 4  }
   0xd   :  { %36 = dma.hbm_to_vmem [thread:$0]  %s1844_s1, 256, %s31_s19, [#allocation6], %s1588_s21, %s1588_s21, %s1589_s22  }
   0xe   :  { %s1590_s25 = smov [#allocation2]  }
   0xf   :  { %s18_s26 = sshll.u32 %s1590_s25, 4  ;;  %s19_s26 = int_to_ptr.vmem [resolvable:$true] %s18_s26 }
  0x10   :  { %s1529_s27 = scalar_lea.vmem %s19_s26, 256  ;;  %p1534_p6 = scmp.lt.s32.totalorder %s19_s26, %s19_s26 }
  0x11   :  { %p1530_p5 = scmp.ne.s32.totalorder %s19_s26, %s1529_s27  ;;  %p1535_p7 = scmp.lt.s32.totalorder %s1529_s27, %s1529_s27 }
  0x13   :  { %p1536_p8 = por %p1535_p7, %p1534_p6 }
  0x15   :  { %p1537_p9 = pnand %p1536_p8, %p1530_p5 }
  0x17   :  { %1540 = shalt.err (!%p1537_p9)
}
  0x18   :  { %s1591_s28 = smov 128   ;;  %s1592_s29 = smov 8  }
  0x19   :  { %24 = dma.hbm_to_vmem [thread:$0]  %s1843_s0, 256, %s19_s26, [#allocation3], %s1591_s28, %s1591_s28, %s1592_s29  }
  0x1a   :  { %s1593_s1 = smov [#allocation7]  }
  0x1b   :  { %s44_s7 = sshll.u32 %s1593_s1, 4  ;;  %s45_s7 = int_to_ptr.vmem [resolvable:$true] %s44_s7 }
  0x1c   :  { %s1549_s8 = scalar_lea.vmem %s45_s7, 256  ;;  %p1554_p11 = scmp.lt.s32.totalorder %s45_s7, %s45_s7 }
  0x1d   :  { %p1550_p10 = scmp.ne.s32.totalorder %s45_s7, %s1549_s8  ;;  %p1555_p12 = scmp.lt.s32.totalorder %s1549_s8, %s1549_s8 }
  0x1f   :  { %p1556_p13 = por %p1555_p12, %p1554_p11 }
  0x21   :  { %p1557_p0 = pnand %p1556_p13, %p1550_p10 }
  0x23   :  { %1560 = shalt.err (!%p1557_p0)
}
  0x24   :  { %50 = dma.hbm_to_vmem [thread:$0]  %s1846_s3, 256, %s45_s7, [#allocation6], %s1588_s21, %s1588_s21, %s1589_s22  }
  0x25   :  { %1581 = dma.done.wait [#allocation3], 256  }
  0x26   :  { %1582 = vsyncadd [#allocation3], 4294967040 }
  0x27   :  { %1583 = dma.done.wait [#allocation6], 512  }
  0x28   :  { %1584 = vsyncadd [#allocation6], 4294966784  ;;  %v1594_v0 = vmov 0.0   ;;  %vm1595_vm0 = vmmov 0   ;;  %v1467_v1 = vld [vmem:[#allocation5 + $0x8] sm:$0xff]   ;;  %v1468_v2 = vld [vmem:[#allocation5] sm:$0xff]  }
  0x29   :  { %1319 = vmatprep.subr.bf16.mxu0 %v1594_v0  ;;  %1323 = vmatprep.mubr.msk.bf16.mxu0 %vm1595_vm0, %v1594_v0  ;;  %v63_v3 = vld [vmem:[#allocation2] sm:$0xff]  ;;  %v64_v4 = vld [vmem:[#allocation2 + $0x8] sm:$0xff]  ;;  %vm89_vm1 = vcmask 261120   ;;  %s1596_s11 = smov 96   ;;  %vm142_vm2 = vcmask 64512   ;;  %vm266_vm3 = vcmask 1043456  }
  0x2a   :  { %1327 = vmatprep.subr.bf16.mxu1 %v1594_v0  ;;  %1329 = vmatprep.mubr.msk.bf16.mxu1 %vm1595_vm0, %v1594_v0  ;;  %v65_v5 = vpack.c.bf16 %v64_v4, %v63_v3  ;;  %v1247_v6 = vld [vmem:[%s1845_s2] ss:$0 sm:$0xff]  ;;  %s1597_s2 = smov 88   ;;  %s1598_s12 = smov 120  }
  0x2b   :  { %1320 = vmatpush3.bf16.msra.mxu0 %v1467_v1  ;;  %s1599_s13 = smov 56   ;;  %s1600_s14 = smov 112  }
  0x2c   :  { %1321 = vmatprep.subr.bf16.mxu0 %v1594_v0  ;;  %s1601_s15 = smov 80   ;;  %s1602_s16 = smov 48  }
  0x2d   :  { %s1603_s17 = smov 72   ;;  %s1604_s18 = smov 104  }
  0x2e   :  { %s1605_s19 = smov 40   ;;  %s1606_s22 = smov [#allocation8]  }
  0x2f   :  { %1322 = vmatpush3.bf16.msra.mxu0 %v1468_v2  ;;  %s1234_s23 = sshll.u32 %s1606_s22, 4  ;;  %s1235_s23 = int_to_ptr.vmem [resolvable:$true] %s1234_s23 }
  0x30   :  { %1333 = vmatprep.subr.bf16.mxu0 %v1594_v0  ;;  %s1561_s24 = scalar_lea.vmem %s1235_s23, 256  ;;  %p1566_p2 = scmp.lt.s32.totalorder %s1235_s23, %s1235_s23 }
  0x31   :  { %p1562_p1 = scmp.ne.s32.totalorder %s1235_s23, %s1561_s24  ;;  %p1567_p3 = scmp.lt.s32.totalorder %s1561_s24, %s1561_s24 }
  0x32   :  { %1324 = vmatmul.mubr.msk.bf16.vlgmr.msra.gmra.mxu0 %vm89_vm1, %v65_v5 }
  0x33   :  { %1335 = vmatprep.mubr.msk.bf16.mxu0 %vm1595_vm0, %v1594_v0  ;;  %p1568_p4 = por %p1567_p3, %p1566_p2 }
  0x35   :  { %p1569_p5 = pnand %p1568_p4, %p1562_p1 }
  0xf2   :  { %v127_v7 = vpop.f32.mrf.mxu0 }
  0xf3   :  { %v128_v8 = vadd.f32 %v1247_v6, %v127_v7 }
  0xf4   :  { %v1325_v9 = vpop.f32.mrf.mxu0 }
  0xf5   :  { %v1667_v10 = vpack.c.bf16 %v128_v8, %v128_v8 }
  0xf6   :  { %v130_v11 = vpop.f32.mrf.mxu0 }
  0xf7   :  { %v131_v12 = vadd.f32 %v1247_v6, %v130_v11  ;;  %140 = vrot.lane.b32.xlu0 %v1667_v10, %s1596_s11 }
  0xf8   :  { %v1326_v13 = vpop.f32.mrf.mxu0 }
  0xf9   :  { %v1670_v14 = vpack.c.bf16 %v131_v12, %v131_v12 }
  0xfb   :  { %189 = vrot.lane.b32.xlu0 %v1670_v14, %s1596_s11 }
 0x169   :  { %v141_v15 = vpop.permute.xlu0 %140 }
 0x16a   :  { %v147_v16 = vsel %vm142_vm2, %v141_v15, 0 }
 0x16b   :  { %1328 = vmatpush3.bf16.xpose.msra.mxu1 %v147_v16 }
 0x16c   :  { %1339 = vmatprep.subr.bf16.mxu1 %v1594_v0 }
 0x16d   :  { %v190_v17 = vpop.permute.xlu0 %189 }
 0x16e   :  { %v195_v18 = vsel %vm142_vm2, %v190_v17, 0 }
 0x16f   :  { %1334 = vmatpush3.bf16.xpose.msra.mxu0 %v195_v18 }
 0x170   :  { %1345 = vmatprep.subr.bf16.mxu0 %v1594_v0 }
 0x172   :  { %1330 = vmatmul.mubr.msk.bf16.vlgmr.msra.gmra.mxu1 %vm142_vm2, %v1667_v10 }
 0x173   :  { %1341 = vmatprep.mubr.msk.bf16.mxu1 %vm1595_vm0, %v1594_v0 }
 0x176   :  { %1336 = vmatmul.mubr.msk.bf16.vlgmr.msra.gmra.mxu0 %vm142_vm2, %v1670_v14 }
 0x177   :  { %1347 = vmatprep.mubr.msk.bf16.mxu0 %vm1595_vm0, %v1594_v0 }
 0x232   :  { %v183_v19 = vpop.f32.mrf.mxu1 }
 0x233   :  { %v237_v20 = vsel %vm142_vm2, %v183_v19, -inf }
 0x234   :  { %238 = vmax.xlane.f32.xlu1 %v237_v20  ;;  %v1331_v21 = vpop.f32.mrf.mxu1 }
 0x236   :  { %v186_v22 = vpop.f32.mrf.mxu1  ;;  %v231_v23 = vpop.f32.mrf.mxu0 }
 0x237   :  { %v240_v24 = vsel %vm142_vm2, %v231_v23, -inf }
 0x238   :  { %v1332_v25 = vpop.f32.mrf.mxu1  ;;  %241 = vmax.xlane.f32.xlu1 %v240_v24  ;;  %v1337_v26 = vpop.f32.mrf.mxu0 }
 0x23a   :  { %v234_v27 = vpop.f32.mrf.mxu0 }
 0x23c   :  { %v1338_v28 = vpop.f32.mrf.mxu0 }
 0x249   :  { %261 = vrot.lane.b32.xlu1 %v1667_v10, %s1588_s21 }
 0x24d   :  { %310 = vrot.lane.b32.xlu1 %v1670_v14, %s1588_s21 }
 0x251   :  { %362 = vrot.lane.b32.xlu1 %v1667_v10, %s1597_s2 }
 0x2bd   :  { %v239_v29 = vpop.xlane.xlu1 %238 }
 0x2be   :  { %v243_v30 = vsub.f32 %v183_v19, %v239_v29 }
 0x2c0   :  { %v245_v31 = vmul.f32 1.442695, %v243_v30 }
 0x2c1   :  { %v242_v32 = vpop.xlane.xlu1 %241 }
 0x2c2   :  { %1469 = vpow2.f32 %v245_v31  ;;  %v244_v33 = vsub.f32 %v231_v23, %v242_v32 }
 0x2c4   :  { %v247_v34 = vmul.f32 1.442695, %v244_v33 }
 0x2c5   :  { %v262_v35 = vpop.permute.xlu1 %261 }
 0x2c6   :  { %1471 = vpow2.f32 %v247_v34  ;;  %v268_v36 = vsel %vm266_vm3, %v262_v35, 0  ;;  %v359_v35 = vld [vmem:[#allocation7] sm:$0xf] }
 0x2c7   :  { %1340 = vmatpush3.bf16.msra.mxu1 %v268_v36 }
 0x2c8   :  { %1351 = vmatprep.subr.bf16.mxu1 %v1594_v0 }
 0x2c9   :  { %v311_v37 = vpop.permute.xlu1 %310 }
 0x2ca   :  { %v316_v38 = vsel %vm266_vm3, %v311_v37, 0 }
 0x2cb   :  { %1346 = vmatpush3.bf16.msra.mxu0 %v316_v38  ;;  %v633_v38 = vsel %vm266_vm3, %v359_v35, 0 }
 0x2cc   :  { %1357 = vmatprep.subr.bf16.mxu0 %v1594_v0 }
 0x2cd   :  { %v363_v43 = vpop.permute.xlu1 %362 }
 0x2ce   :  { %v368_v50 = vsel %vm142_vm2, %v363_v43, 0  ;;  %v581_v43 = vld [vmem:[#allocation7 + $0x4] sm:$0xf] }
 0x2cf   :  { %v1470_v39 = vpop.eup %1469 }
 0x2d0   :  { %v249_v40 = vsel %vm142_vm2, %v1470_v39, 0.0 }
 0x2d1   :  { %250 = vadd.xlane.f32.xlu0 %v249_v40 }
 0x2d3   :  { %v1472_v41 = vpop.eup %1471 }
 0x2d4   :  { %v252_v42 = vsel %vm142_vm2, %v1472_v41, 0.0 }
 0x2d5   :  { %253 = vadd.xlane.f32.xlu1 %v252_v42 }
 0x2e6   :  { %412 = vrot.lane.b32.xlu1 %v1670_v14, %s1597_s2 }
 0x2e7   :  { %360 = vrot.lane.b32.xlu0 %v1667_v10, %s1598_s12 }
 0x2ea   :  { %410 = vrot.lane.b32.xlu1 %v1670_v14, %s1598_s12 }
 0x35a   :  { %v251_v44 = vpop.xlane.xlu0 %250 }
 0x35b   :  { %1473 = vrcp.f32 %v251_v44  ;;  %v586_v44 = vsel %vm266_vm3, %v581_v43, 0 }
 0x35e   :  { %v254_v45 = vpop.xlane.xlu1 %253  ;;  %v361_v55 = vpop.permute.xlu0 %360 }
 0x35f   :  { %1475 = vrcp.f32 %v254_v45 }
 0x362   :  { %v413_v52 = vpop.permute.xlu1 %412 }
 0x363   :  { %v418_v54 = vsel %vm142_vm2, %v413_v52, 0 }
 0x366   :  { %v411_v56 = vpop.permute.xlu1 %410 }
 0x368   :  { %v1474_v46 = vpop.eup %1473 }
 0x369   :  { %v257_v47 = vmul.f32 %v1474_v46, %v1470_v39 }
 0x36b   :  { %v259_v48 = vpack.c.bf16 %v257_v47, %v257_v47 }
 0x36c   :  { %v1476_v49 = vpop.eup %1475 }
 0x36d   :  { %1342 = vmatmul.mubr.msk.bf16.vlgmr.msra.gmra.mxu1 %vm142_vm2, %v259_v48  ;;  %v258_v51 = vmul.f32 %v1476_v49, %v1472_v41 }
 0x36e   :  { %1352 = vmatpush3.bf16.xpose.msra.mxu1 %v368_v50  ;;  %1353 = vmatprep.mubr.msk.bf16.mxu1 %vm1595_vm0, %v1594_v0 }
 0x36f   :  { %v260_v53 = vpack.c.bf16 %v258_v51, %v258_v51  ;;  %1363 = vmatprep.subr.bf16.mxu1 %v1594_v0 }
 0x371   :  { %1348 = vmatmul.mubr.msk.bf16.vlgmr.msra.gmra.mxu0 %vm142_vm2, %v260_v53 }
 0x372   :  { %1358 = vmatpush3.bf16.xpose.msra.mxu0 %v418_v54  ;;  %1359 = vmatprep.mubr.msk.bf16.mxu0 %vm1595_vm0, %v1594_v0 }
 0x373   :  { %1369 = vmatprep.subr.bf16.mxu0 %v1594_v0 }
 0x375   :  { %1354 = vmatmul.mubr.msk.bf16.vlgmr.msra.gmra.mxu1 %vm142_vm2, %v361_v55 }
 0x376   :  { %1365 = vmatprep.mubr.msk.bf16.mxu1 %vm1595_vm0, %v1594_v0 }
 0x379   :  { %1360 = vmatmul.mubr.msk.bf16.vlgmr.msra.gmra.mxu0 %vm142_vm2, %v411_v56 }
 0x37a   :  { %1371 = vmatprep.mubr.msk.bf16.mxu0 %vm1595_vm0, %v1594_v0 }
 0x42d   :  { %v1717_v57 = vpop.f32.mrf.mxu1 }
 0x42f   :  { %v1343_v58 = vpop.f32.mrf.mxu1 }
 0x431   :  { %v307_v59 = vpop.f32.mrf.mxu1  ;;  %v1719_v60 = vpop.f32.mrf.mxu0 }
 0x432   :  { %v358_v61 = vpack.c.bf16 %v1719_v60, %v1717_v57 }
 0x433   :  { %v1344_v62 = vpop.f32.mrf.mxu1  ;;  %v1349_v63 = vpop.f32.mrf.mxu0 }
 0x435   :  { %v355_v1 = vpop.f32.mrf.mxu0  ;;  %v404_v2 = vpop.f32.mrf.mxu1 }
 0x436   :  { %v460_v3 = vsel %vm142_vm2, %v404_v2, -inf }
 0x437   :  { %461 = vmax.xlane.f32.xlu1 %v460_v3  ;;  %v1350_v4 = vpop.f32.mrf.mxu0  ;;  %v1355_v5 = vpop.f32.mrf.mxu1 }
 0x439   :  { %v407_v6 = vpop.f32.mrf.mxu1  ;;  %v454_v7 = vpop.f32.mrf.mxu0 }
 0x43a   :  { %v463_v8 = vsel %vm142_vm2, %v454_v7, -inf }
 0x43b   :  { %v1356_v9 = vpop.f32.mrf.mxu1  ;;  %464 = vmax.xlane.f32.xlu0 %v463_v8  ;;  %v1361_v11 = vpop.f32.mrf.mxu0 }
 0x43d   :  { %v457_v12 = vpop.f32.mrf.mxu0 }
 0x43f   :  { %v1362_v13 = vpop.f32.mrf.mxu0 }
 0x451   :  { %532 = vrot.lane.b32.xlu0 %v1670_v14, %s1599_s13 }
 0x455   :  { %676 = vrot.lane.b32.xlu0 %v1667_v10, %s1600_s14 }
 0x4c0   :  { %v462_v15 = vpop.xlane.xlu1 %461 }
 0x4c1   :  { %v466_v16 = vsub.f32 %v404_v2, %v462_v15 }
 0x4c3   :  { %v468_v17 = vmul.f32 1.442695, %v466_v16 }
 0x4c4   :  { %v465_v18 = vpop.xlane.xlu0 %464 }
 0x4c5   :  { %1477 = vpow2.f32 %v468_v17  ;;  %v467_v19 = vsub.f32 %v454_v7, %v465_v18 }
 0x4c7   :  { %v470_v20 = vmul.f32 1.442695, %v467_v19 }
 0x4c8   :  { %v533_v21 = vpop.permute.xlu0 %532 }
 0x4c9   :  { %1479 = vpow2.f32 %v470_v20  ;;  %v538_v22 = vsel %vm266_vm3, %v533_v21, 0 }
 0x4ca   :  { %1370 = vmatpush3.bf16.msra.mxu0 %v538_v22 }
 0x4cb   :  { %1381 = vmatprep.subr.bf16.mxu0 %v1594_v0 }
 0x4cc   :  { %v677_v56 = vpop.permute.xlu0 %676 }
 0x4d2   :  { %v1478_v23 = vpop.eup %1477 }
 0x4d3   :  { %v472_v24 = vsel %vm142_vm2, %v1478_v23, 0.0 }
 0x4d4   :  { %473 = vadd.xlane.f32.xlu1 %v472_v24 }
 0x4d6   :  { %v1480_v25 = vpop.eup %1479 }
 0x4d7   :  { %v475_v26 = vsel %vm142_vm2, %v1480_v25, 0.0 }
 0x4d8   :  { %476 = vadd.xlane.f32.xlu1 %v475_v26 }
 0x4e9   :  { %484 = vrot.lane.b32.xlu1 %v1667_v10, %s1599_s13 }
 0x4ed   :  { %678 = vrot.lane.b32.xlu1 %v1667_v10, %s1601_s15 }
 0x4f1   :  { %728 = vrot.lane.b32.xlu1 %v1670_v14, %s1601_s15 }
 0x4f5   :  { %726 = vrot.lane.b32.xlu1 %v1670_v14, %s1600_s14 }
 0x55d   :  { %v474_v27 = vpop.xlane.xlu1 %473 }
 0x55e   :  { %1481 = vrcp.f32 %v474_v27 }
 0x561   :  { %v477_v28 = vpop.xlane.xlu1 %476 }
 0x562   :  { %1483 = vrcp.f32 %v477_v28 }
 0x565   :  { %v485_v29 = vpop.permute.xlu1 %484 }
 0x566   :  { %v490_v30 = vsel %vm266_vm3, %v485_v29, 0 }
 0x567   :  { %1364 = vmatpush3.bf16.msra.mxu1 %v490_v30 }
 0x568   :  { %1375 = vmatprep.subr.bf16.mxu1 %v1594_v0 }
 0x569   :  { %v679_v39 = vpop.permute.xlu1 %678 }
 0x56a   :  { %v684_v52 = vsel %vm142_vm2, %v679_v39, 0 }
 0x56b   :  { %v1482_v31 = vpop.eup %1481 }
 0x56c   :  { %v480_v32 = vmul.f32 %v1482_v31, %v1478_v23 }
 0x56d   :  { %v729_v40 = vpop.permute.xlu1 %728 }
 0x56e   :  { %v482_v33 = vpack.c.bf16 %v480_v32, %v480_v32  ;;  %v734_v41 = vsel %vm142_vm2, %v729_v40, 0 }
 0x56f   :  { %v1484_v34 = vpop.eup %1483 }
 0x570   :  { %1366 = vmatmul.mubr.msk.bf16.vlgmr.msra.gmra.mxu1 %vm142_vm2, %v482_v33  ;;  %v481_v36 = vmul.f32 %v1484_v34, %v1480_v25 }
 0x571   :  { %1377 = vmatprep.mubr.msk.bf16.mxu1 %vm1595_vm0, %v1594_v0  ;;  %v727_v42 = vpop.permute.xlu1 %726  ;;  %1376 = vmatpush3.bf16.msra.mxu1 %v586_v44 }
 0x572   :  { %v483_v37 = vpack.c.bf16 %v481_v36, %v481_v36  ;;  %1387 = vmatprep.subr.bf16.mxu1 %v1594_v0 }
 0x574   :  { %1372 = vmatmul.mubr.msk.bf16.vlgmr.msra.gmra.mxu0 %vm142_vm2, %v483_v37 }
 0x575   :  { %1382 = vmatpush3.bf16.msra.mxu0 %v633_v38  ;;  %1383 = vmatprep.mubr.msk.bf16.mxu0 %vm1595_vm0, %v1594_v0  ;;  %v897_v38 = vld [vmem:[#allocation7 + $0x8] sm:$0xf] }
 0x576   :  { %1393 = vmatprep.subr.bf16.mxu0 %v1594_v0  ;;  %v902_v39 = vsel %vm266_vm3, %v897_v38, 0 }
 0x57c   :  { %1384 = vmatmul.mubr.msk.bf16.vlgmr.msra.gmra.mxu0 %vm142_vm2, %v358_v61 }
 0x57d   :  { %1394 = vmatpush3.bf16.xpose.msra.mxu0 %v734_v41  ;;  %1395 = vmatprep.mubr.msk.bf16.mxu0 %vm1595_vm0, %v1594_v0 }
 0x57e   :  { %1405 = vmatprep.subr.bf16.mxu0 %v1594_v0 }
 0x584   :  { %1396 = vmatmul.mubr.msk.bf16.vlgmr.msra.gmra.mxu0 %vm142_vm2, %v727_v42 }
 0x585   :  { %1407 = vmatprep.mubr.msk.bf16.mxu0 %vm1595_vm0, %v1594_v0 }
 0x630   :  { %v526_v45 = vpop.f32.mrf.mxu1 }
 0x632   :  { %v1367_v46 = vpop.f32.mrf.mxu1 }
 0x634   :  { %v529_v47 = vpop.f32.mrf.mxu1  ;;  %v574_v48 = vpop.f32.mrf.mxu0 }
 0x635   :  { %v580_v49 = vpack.c.bf16 %v574_v48, %v526_v45 }
 0x636   :  { %v1368_v50 = vpop.f32.mrf.mxu1  ;;  %v1373_v51 = vpop.f32.mrf.mxu0 }
 0x637   :  { %1378 = vmatmul.mubr.msk.bf16.vlgmr.msra.gmra.mxu1 %vm142_vm2, %v580_v49 }
 0x638   :  { %1388 = vmatpush3.bf16.xpose.msra.mxu1 %v684_v52  ;;  %v577_v53 = vpop.f32.mrf.mxu0  ;;  %1389 = vmatprep.mubr.msk.bf16.mxu1 %vm1595_vm0, %v1594_v0 }
 0x639   :  { %1399 = vmatprep.subr.bf16.mxu1 %v1594_v0 }
 0x63a   :  { %v1374_v54 = vpop.f32.mrf.mxu0 }
 0x63c   :  { %v1763_v55 = vpop.f32.mrf.mxu0 }
 0x63e   :  { %v1385_v57 = vpop.f32.mrf.mxu0 }
 0x63f   :  { %1390 = vmatmul.mubr.msk.bf16.vlgmr.msra.gmra.mxu1 %vm142_vm2, %v677_v56 }
 0x640   :  { %v1766_v58 = vpop.f32.mrf.mxu0  ;;  %1401 = vmatprep.mubr.msk.bf16.mxu1 %vm1595_vm0, %v1594_v0 }
 0x642   :  { %v1386_v59 = vpop.f32.mrf.mxu0 }
 0x644   :  { %v770_v60 = vpop.f32.mrf.mxu0 }
 0x645   :  { %v779_v61 = vsel %vm142_vm2, %v770_v60, -inf }
 0x646   :  { %780 = vmax.xlane.f32.xlu1 %v779_v61  ;;  %v1397_v62 = vpop.f32.mrf.mxu0 }
 0x648   :  { %v773_v63 = vpop.f32.mrf.mxu0 }
 0x64a   :  { %v1398_v1 = vpop.f32.mrf.mxu0 }
 0x657   :  { %800 = vrot.lane.b32.xlu1 %v1667_v10, %s1602_s16 }
 0x65b   :  { %949 = vrot.lane.b32.xlu1 %v1667_v10, %s1603_s17 }
 0x65f   :  { %999 = vrot.lane.b32.xlu1 %v1670_v14, %s1603_s17 }
 0x663   :  { %997 = vrot.lane.b32.xlu1 %v1670_v14, %s1604_s18 }
 0x6cf   :  { %v781_v2 = vpop.xlane.xlu1 %780 }
 0x6d0   :  { %v783_v5 = vsub.f32 %v770_v60, %v781_v2 }
 0x6d2   :  { %v786_v6 = vmul.f32 1.442695, %v783_v5 }
 0x6d3   :  { %v801_v3 = vpop.permute.xlu1 %800 }
 0x6d4   :  { %v806_v4 = vsel %vm266_vm3, %v801_v3, 0  ;;  %1485 = vpow2.f32 %v786_v6 }
 0x6d5   :  { %1400 = vmatpush3.bf16.msra.mxu1 %v806_v4 }
 0x6d6   :  { %1411 = vmatprep.subr.bf16.mxu1 %v1594_v0 }
 0x6d7   :  { %v950_v31 = vpop.permute.xlu1 %949 }
 0x6d8   :  { %v955_v33 = vsel %vm142_vm2, %v950_v31, 0 }
 0x6db   :  { %v1000_v45 = vpop.permute.xlu1 %999 }
 0x6dc   :  { %v1005_v52 = vsel %vm142_vm2, %v1000_v45, 0 }
 0x6df   :  { %v998_v57 = vpop.permute.xlu1 %997 }
 0x6e1   :  { %v1486_v15 = vpop.eup %1485 }
 0x6e2   :  { %v791_v18 = vsel %vm142_vm2, %v1486_v15, 0.0 }
 0x6f7   :  { %v1779_v7 = vpop.f32.mrf.mxu1 }
 0x6f8   :  { %v670_v1 = vadd.f32 %v1763_v55, %v1779_v7 }
 0x6f9   :  { %v1379_v8 = vpop.f32.mrf.mxu1 }
 0x6fb   :  { %v1781_v9 = vpop.f32.mrf.mxu1 }
 0x6fc   :  { %v673_v5 = vadd.f32 %v1766_v58, %v1781_v9 }
 0x6fd   :  { %v1380_v11 = vpop.f32.mrf.mxu1 }
 0x6ff   :  { %v720_v12 = vpop.f32.mrf.mxu1 }
 0x700   :  { %v776_v13 = vsel %vm142_vm2, %v720_v12, -inf }
 0x701   :  { %777 = vmax.xlane.f32.xlu0 %v776_v13  ;;  %v1391_v16 = vpop.f32.mrf.mxu1 }
 0x703   :  { %v723_v17 = vpop.f32.mrf.mxu1 }
 0x705   :  { %v1392_v19 = vpop.f32.mrf.mxu1  ;;  %792 = vadd.xlane.f32.xlu0 %v791_v18 }
 0x78a   :  { %v778_v20 = vpop.xlane.xlu0 %777 }
 0x78b   :  { %v782_v21 = vsub.f32 %v720_v12, %v778_v20 }
 0x78d   :  { %v784_v22 = vmul.f32 1.442695, %v782_v21 }
 0x78e   :  { %v793_v25 = vpop.xlane.xlu0 %792 }
 0x78f   :  { %1487 = vpow2.f32 %v784_v22 }
 0x790   :  { %1489 = vrcp.f32 %v793_v25 }
 0x79c   :  { %v1488_v23 = vpop.eup %1487 }
 0x79d   :  { %v788_v24 = vsel %vm142_vm2, %v1488_v23, 0.0  ;;  %v1490_v26 = vpop.eup %1489 }
 0x79e   :  { %789 = vadd.xlane.f32.xlu0 %v788_v24  ;;  %v797_v28 = vmul.f32 %v1490_v26, %v1486_v15  ;;  %v1168_v24 = vld [vmem:[#allocation7 + $0xc] sm:$0xf] }
 0x79f   :  { %v1173_v25 = vsel %vm266_vm3, %v1168_v24, 0 }
 0x7a0   :  { %v799_v32 = vpack.c.bf16 %v797_v28, %v797_v28 }
 0x7b4   :  { %848 = vrot.lane.b32.xlu0 %v1670_v14, %s1602_s16 }
 0x7b8   :  { %947 = vrot.lane.b32.xlu0 %v1667_v10, %s1604_s18 }
 0x827   :  { %v790_v27 = vpop.xlane.xlu0 %789 }
 0x828   :  { %1491 = vrcp.f32 %v790_v27 }
 0x82b   :  { %v849_v29 = vpop.permute.xlu0 %848 }
 0x82c   :  { %v854_v30 = vsel %vm266_vm3, %v849_v29, 0 }
 0x82d   :  { %1406 = vmatpush3.bf16.msra.mxu0 %v854_v30 }
 0x82e   :  { %1417 = vmatprep.subr.bf16.mxu0 %v1594_v0 }
 0x82f   :  { %v948_v36 = vpop.permute.xlu0 %947 }
 0x830   :  { %1408 = vmatmul.mubr.msk.bf16.vlgmr.msra.gmra.mxu0 %vm142_vm2, %v799_v32 }
 0x831   :  { %1418 = vmatpush3.bf16.xpose.msra.mxu0 %v955_v33  ;;  %1419 = vmatprep.mubr.msk.bf16.mxu0 %vm1595_vm0, %v1594_v0 }
 0x832   :  { %1429 = vmatprep.subr.bf16.mxu0 %v1594_v0 }
 0x835   :  { %v1492_v34 = vpop.eup %1491 }
 0x836   :  { %v796_v35 = vmul.f32 %v1492_v34, %v1488_v23 }
 0x838   :  { %1420 = vmatmul.mubr.msk.bf16.vlgmr.msra.gmra.mxu0 %vm142_vm2, %v948_v36  ;;  %v798_v37 = vpack.c.bf16 %v796_v35, %v796_v35 }
 0x839   :  { %1431 = vmatprep.mubr.msk.bf16.mxu0 %vm1595_vm0, %v1594_v0 }
 0x83a   :  { %1402 = vmatmul.mubr.msk.bf16.vlgmr.msra.gmra.mxu1 %vm142_vm2, %v798_v37 }
 0x83b   :  { %1413 = vmatprep.mubr.msk.bf16.mxu1 %vm1595_vm0, %v1594_v0  ;;  %1412 = vmatpush3.bf16.msra.mxu1 %v902_v39 }
 0x83c   :  { %1423 = vmatprep.subr.bf16.mxu1 %v1594_v0 }
 0x8f0   :  { %v890_v40 = vpop.f32.mrf.mxu0 }
 0x8f2   :  { %v1409_v41 = vpop.f32.mrf.mxu0 }
 0x8f4   :  { %v893_v42 = vpop.f32.mrf.mxu0 }
 0x8f6   :  { %v1410_v43 = vpop.f32.mrf.mxu0 }
 0x8f8   :  { %v991_v44 = vpop.f32.mrf.mxu0 }
 0x8f9   :  { %v1047_v46 = vsel %vm142_vm2, %v991_v44, -inf }
 0x8fa   :  { %v842_v47 = vpop.f32.mrf.mxu1  ;;  %1048 = vmax.xlane.f32.xlu0 %v1047_v46  ;;  %v1421_v48 = vpop.f32.mrf.mxu0 }
 0x8fb   :  { %v896_v49 = vpack.c.bf16 %v890_v40, %v842_v47  ;;  %v1273_v40 = vld [vmem:[%s1847_s4] ss:$0 sm:$0xff] }
 0x8fc   :  { %v1403_v50 = vpop.f32.mrf.mxu1  ;;  %v994_v51 = vpop.f32.mrf.mxu0 }
 0x8fd   :  { %1414 = vmatmul.mubr.msk.bf16.vlgmr.msra.gmra.mxu1 %vm142_vm2, %v896_v49 }
 0x8fe   :  { %1424 = vmatpush3.bf16.xpose.msra.mxu1 %v1005_v52  ;;  %v845_v53 = vpop.f32.mrf.mxu1  ;;  %v1422_v54 = vpop.f32.mrf.mxu0  ;;  %1425 = vmatprep.mubr.msk.bf16.mxu1 %vm1595_vm0, %v1594_v0 }
 0x8ff   :  { %1435 = vmatprep.subr.bf16.mxu1 %v1594_v0 }
 0x900   :  { %v1404_v56 = vpop.f32.mrf.mxu1 }
 0x905   :  { %1426 = vmatmul.mubr.msk.bf16.vlgmr.msra.gmra.mxu1 %vm142_vm2, %v998_v57 }
 0x906   :  { %1437 = vmatprep.mubr.msk.bf16.mxu1 %vm1595_vm0, %v1594_v0 }
 0x983   :  { %v1049_v59 = vpop.xlane.xlu0 %1048 }
 0x984   :  { %v1053_v60 = vsub.f32 %v991_v44, %v1049_v59 }
 0x986   :  { %v1055_v61 = vmul.f32 1.442695, %v1053_v60 }
 0x988   :  { %1493 = vpow2.f32 %v1055_v61 }
 0x995   :  { %v1494_v62 = vpop.eup %1493 }
 0x996   :  { %v1059_v63 = vsel %vm142_vm2, %v1494_v62, 0.0 }
 0x997   :  { %1060 = vadd.xlane.f32.xlu0 %v1059_v63 }
 0x9bd   :  { %v938_v2 = vpop.f32.mrf.mxu1 }
 0x9be   :  { %v945_v3 = vadd.f32 %v938_v2, %v670_v1 }
 0x9bf   :  { %v1415_v4 = vpop.f32.mrf.mxu1 }
 0x9c1   :  { %v941_v6 = vpop.f32.mrf.mxu1 }
 0x9c2   :  { %v946_v8 = vadd.f32 %v941_v6, %v673_v5 }
 0x9c3   :  { %v1416_v11 = vpop.f32.mrf.mxu1 }
 0x9c5   :  { %v1041_v12 = vpop.f32.mrf.mxu1 }
 0x9c6   :  { %v1050_v13 = vsel %vm142_vm2, %v1041_v12, -inf }
 0x9c7   :  { %1051 = vmax.xlane.f32.xlu1 %v1050_v13  ;;  %v1427_v15 = vpop.f32.mrf.mxu1 }
 0x9c9   :  { %v1044_v16 = vpop.f32.mrf.mxu1 }
 0x9cb   :  { %v1428_v17 = vpop.f32.mrf.mxu1 }
 0x9d8   :  { %1071 = vrot.lane.b32.xlu1 %v1667_v10, %s1605_s19 }
 0xa20   :  { %v1061_v55 = vpop.xlane.xlu0 %1060 }
 0xa21   :  { %1495 = vrcp.f32 %v1061_v55 }
 0xa2e   :  { %v1496_v7 = vpop.eup %1495 }
 0xa2f   :  { %v1067_v58 = vmul.f32 %v1496_v7, %v1494_v62 }
 0xa31   :  { %v1069_v22 = vpack.c.bf16 %v1067_v58, %v1067_v58 }
 0xa50   :  { %v1052_v18 = vpop.xlane.xlu1 %1051 }
 0xa51   :  { %v1054_v19 = vsub.f32 %v1041_v12, %v1052_v18 }
 0xa53   :  { %v1057_v20 = vmul.f32 1.442695, %v1054_v19 }
 0xa54   :  { %v1072_v9 = vpop.permute.xlu1 %1071 }
 0xa55   :  { %1497 = vpow2.f32 %v1057_v20  ;;  %v1077_v21 = vsel %vm266_vm3, %v1072_v9, 0 }
 0xa56   :  { %1430 = vmatpush3.bf16.msra.mxu0 %v1077_v21 }
 0xa57   :  { %1441 = vmatprep.subr.bf16.mxu0 %v1594_v0 }
 0xa59   :  { %1432 = vmatmul.mubr.msk.bf16.vlgmr.msra.gmra.mxu0 %vm142_vm2, %v1069_v22 }
 0xa5a   :  { %1443 = vmatprep.mubr.msk.bf16.mxu0 %vm1595_vm0, %v1594_v0  ;;  %1442 = vmatpush3.bf16.msra.mxu0 %v1173_v25 }
 0xa62   :  { %v1498_v10 = vpop.eup %1497 }
 0xa63   :  { %v1062_v23 = vsel %vm142_vm2, %v1498_v10, 0.0 }
 0xa64   :  { %1063 = vadd.xlane.f32.xlu0 %v1062_v23 }
 0xa7a   :  { %1119 = vrot.lane.b32.xlu0 %v1670_v14, %s1605_s19 }
 0xaed   :  { %v1064_v26 = vpop.xlane.xlu0 %1063 }
 0xaee   :  { %1499 = vrcp.f32 %v1064_v26 }
 0xaf1   :  { %v1120_v27 = vpop.permute.xlu0 %1119 }
 0xaf2   :  { %v1125_v28 = vsel %vm266_vm3, %v1120_v27, 0 }
 0xaf3   :  { %1436 = vmatpush3.bf16.msra.mxu1 %v1125_v28 }
 0xafb   :  { %v1500_v29 = vpop.eup %1499 }
 0xafc   :  { %v1068_v30 = vmul.f32 %v1500_v29, %v1498_v10 }
 0xafe   :  { %v1070_v31 = vpack.c.bf16 %v1068_v30, %v1068_v30 }
 0xb00   :  { %1438 = vmatmul.mubr.msk.bf16.vlgmr.msra.gmra.mxu1 %vm142_vm2, %v1070_v31 }
 0xb19   :  { %v1113_v0 = vpop.f32.mrf.mxu0 }
 0xb1b   :  { %v1433_v32 = vpop.f32.mrf.mxu0 }
 0xb1d   :  { %v1116_v33 = vpop.f32.mrf.mxu0 }
 0xb1f   :  { %v1434_v34 = vpop.f32.mrf.mxu0 }
 0xbc0   :  { %v1161_v14 = vpop.f32.mrf.mxu1 }
 0xbc1   :  { %v1167_v35 = vpack.c.bf16 %v1161_v14, %v1113_v0 }
 0xbc2   :  { %v1439_v36 = vpop.f32.mrf.mxu1 }
 0xbc3   :  { %1444 = vmatmul.mubr.msk.bf16.vlgmr.msra.gmra.mxu0 %vm142_vm2, %v1167_v35 }
 0xbc4   :  { %v1164_v37 = vpop.f32.mrf.mxu1 }
 0xbc6   :  { %v1440_v38 = vpop.f32.mrf.mxu1 }
 0xc83   :  { %v1209_v39 = vpop.f32.mrf.mxu0 }
 0xc84   :  { %v1216_v41 = vadd.f32 %v1209_v39, %v945_v3 }
 0xc85   :  { %v1445_v42 = vpop.f32.mrf.mxu0 }
 0xc86   :  { %v1225_v43 = vadd.f32 %v1273_v40, %v1216_v41 }
 0xc87   :  { %v1212_v44 = vpop.f32.mrf.mxu0 }
 0xc88   :  { %1227 = vst.msk [vmem:[#allocation8] sm:$0xff] %vm89_vm1, %v1225_v43  ;;  %v1217_v45 = vadd.f32 %v1212_v44, %v946_v8 }
 0xc89   :  { %v1446_v46 = vpop.f32.mrf.mxu0 }
 0xc8a   :  { %v1226_v47 = vadd.f32 %v1273_v40, %v1217_v45 }
 0xc8c   :  { %1228 = vst.msk [vmem:[#allocation8 + $0x8] sm:$0xff] %vm89_vm1, %v1226_v47 }
 0xc8d   :  { %1572 = shalt.err (!%p1569_p5)
}
 0xc8e   :  { %1240 = dma.vmem_to_hbm [thread:$0]  %s1235_s23, 256, %s1848_s5, [#allocation4], %s1591_s28, %s1591_s28, %s1592_s29  }
 0xc8f   :  { %1585 = dma.done.wait [#allocation4], 256  }
 0xc90   :  { %1586 = vsyncadd [#allocation4], 4294967040 }
 0xc91   :  { %1244 = vsyncpa [#allocation3], 1 }
 0xc92   :  { %1245 = vsyncpa [#allocation6], 1 }
 0xc93   :  { %1246 = vsyncpa [#allocation4], 1 }

</bundles_post_ra>
